<compile_context>
chip_gen: v7x
topology: tpu7x:2x2x1
jax: 0.10.0
libtpu: 0.0.40
codegen_flags: <defaults>
</compile_context>

<pallas_src>
from typing import Dict, Optional

import jax
import jax.numpy as jnp
from jax.experimental import pallas as pl
from jax.experimental.pallas import tpu as pltpu


# ---------------------------------------------------------------------------
# Pallas kernel: feature pass-through as ONE HBM -> HBM DMA.
# ---------------------------------------------------------------------------
def _copy_kernel(x_hbm_ref, o_hbm_ref, sem):
    # Whole-array DMA straight between HBM buffers; no VMEM staging, no grid.
    cp = pltpu.make_async_copy(x_hbm_ref, o_hbm_ref, sem)
    cp.start()
    cp.wait()


def passthrough(x: jnp.ndarray) -> jnp.ndarray:
    """Materialize a copy of `x` via a single HBM->HBM DMA (fusion point).

    Prefer NOT calling this at all for a pure identity path (see
    BackBone.forward); it exists only when a distinct output buffer must be
    produced.  Works for any shape/dtype: the DMA is shape-agnostic, so there
    are no (8,128) tiling, lane-density, or scoped-VMEM-footprint concerns on
    v5e / v6e / v7x.
    """
    return pl.pallas_call(
        _copy_kernel,
        out_shape=jax.ShapeDtypeStruct(x.shape, x.dtype),
        in_specs=[pl.BlockSpec(memory_space=pl.ANY)],
        out_specs=pl.BlockSpec(memory_space=pl.ANY),
        scratch_shapes=[pltpu.SemaphoreType.DMA],
    )(x)


# ---------------------------------------------------------------------------
# BackBone wrapper (glue in plain JAX / Python, mirroring the nn.Module init).
# ---------------------------------------------------------------------------
class BackBone:
    def __init__(self, n_class: int, binary_mode: bool = False):
        if binary_mode:
            assert n_class == 2
            n_class = 1
        self.n_class = n_class
        # nn.Parameter(torch.empty(0)) -> zero-size array (device probe only)
        self.dummy_param = jnp.empty((0,), dtype=jnp.float32)

    @property
    def device(self):
        return self.dummy_param.devices()

    def get_device(self):
        return self.dummy_param.devices()

    def forward(
        self,
        batch: Dict,
        return_features: Optional[bool] = False,
        materialize: bool = False,
    ):
        # TODO(synk): BackBone.forward is @abstractmethod (`pass`) in PyTorch;
        # there is no defined computation.  The only concrete data path is the
        # feature pass-through.  Fast path: return the array directly (free,
        # no kernel launch).  Only when an explicit fresh buffer is requested
        # do we run the single-DMA Pallas kernel.
        if return_features:
            feats = batch["features"]
            if materialize:
                return passthrough(feats)
            return feats
        return None


# ---------------------------------------------------------------------------
# Demo / smoke test.
# ---------------------------------------------------------------------------
if __name__ == "__main__":
    key = jax.random.PRNGKey(0)

    model = BackBone(n_class=2, binary_mode=True)  # n_class collapses to 1
    assert model.n_class == 1

    # Small, module-consistent feature batch: [batch=8, hidden=128] f32.
    feats = jax.random.normal(key, (8, 128), dtype=jnp.float32)

    # Kernel path (explicit materialization): single HBM->HBM DMA.
    out = model.forward({"features": feats}, return_features=True, materialize=True)
    out = jax.block_until_ready(out)
    assert out.shape == feats.shape and out.dtype == feats.dtype
    assert bool(jnp.allclose(out, feats))

    # Ragged / odd shape + bf16: DMA copy is shape-agnostic (no tiling rules).
    feats_bf16 = jax.random.normal(key, (13, 96), dtype=jnp.bfloat16)
    out2 = jax.block_until_ready(passthrough(feats_bf16))
    assert out2.shape == feats_bf16.shape and out2.dtype == feats_bf16.dtype
    assert bool(jnp.all(out2 == feats_bf16))

    # Default fast path: no kernel launched, features returned as-is.
    out3 = model.forward({"features": feats}, return_features=True)
    assert out3 is feats

    # Abstract forward with return_features=False returns nothing (like `pass`).
    assert model.forward({"features": feats}) is None

    print("KERNEL_OK")
</pallas_src>

<mosaic_0001>
module attributes {stable_mosaic.version = 11 : i64} {
  func.func @_copy_kernel(%arg0: memref<8x128xf32, #tpu.memory_space<any>>, %arg1: memref<8x128xf32, #tpu.memory_space<any>>, %arg2: memref<!tpu.dma_semaphore, #tpu.memory_space<semaphore_mem>>) attributes {dimension_semantics = [], scalar_prefetch = 0 : i64, scratch_operands = 1 : i64, tpu.core_type = #tpu.core_type<tc>} {
    tpu.enqueue_dma source(%arg0 : memref<8x128xf32, #tpu.memory_space<any>>) target(%arg1 : memref<8x128xf32, #tpu.memory_space<any>>) target_semaphore(%arg2 : memref<!tpu.dma_semaphore, #tpu.memory_space<semaphore_mem>>)
    tpu.wait_dma2 semaphore(%arg2 : memref<!tpu.dma_semaphore, #tpu.memory_space<semaphore_mem>>) src(%arg0 : memref<8x128xf32, #tpu.memory_space<any>>) dst(%arg1 : memref<8x128xf32, #tpu.memory_space<any>>)
    return
  }
}

</mosaic_0001>

<bundles_post_ra>
// kernel: tpu_custom_call.1
= control target key start
LH: loop header
LB: loop body
LE: loop exit
PB: predicated region body
PF: predicated region fallthrough
CT: control target
= control target key end

     0   :  { %s34_s6 = smov [#allocation2]   ;;  %s35_s7 = smov [#allocation3]   ;;  %s53_s0 = inlined_call_operand.hbm [shape: f32[8,128], index: 0, kind: input, shape index: {}]   ;;  %s54_s1 = inlined_call_operand.hbm [shape: f32[8,128], index: 1, kind: output, shape index: {}]  }
   0x1   :  { %s36_s8 = smov 0  }
   0x2   :  { %18 = dma.general %s53_s0, 128, %s54_s1, %s34_s6, %s35_s7, [#allocation4], %s36_s8, 0  }
   0x3   :  { %32 = dma.done.wait [#allocation2], 128 }
   0x4   :  { %33 = vsyncadd [#allocation2], 4294967168 }
   0x5   :  { %22 = vsyncmov [#allocation2] }
   0x8   :  { %s23_s13 = vpop.sfrf %22 }
   0x9   :  { %p28_p0 = scmp.ne.s32.totalorder %s23_s13, 0 }
   0xb   :  { %27 = shalt.err (%p28_p0)  }

</bundles_post_ra>
